<compile_context>
chip_gen: v6e
topology: v6e:2x2x1
jax: 0.10.0
libtpu: 0.0.40
codegen_flags: <defaults>
</compile_context>

<pallas_src>
import jax
import jax.numpy as jnp
from jax import lax
from jax.experimental import pallas as pl
from jax.experimental.pallas import tpu as pltpu

_IN, _HID = 25, 10

# Parameter-slab layout (all reads start at row 0 -> sublane-aligned):
#   rows 0:25, cols  0:30  -> W_comb  (25, 30)
#   row  0,    cols 64:94  -> b_comb  (1, 30)
_SLAB_SHAPE = (32, 128)
_BIAS_COL = 64


def _attn_kernel(x1_ref, x2_ref, p_ref, o_ref):
    # Fused & pre-composed projection: kqv = (x1 + x2) @ W_comb + b_comb
    x = x1_ref[...] + x2_ref[...]                                        # (B, 25)
    w = p_ref[0:_IN, 0:3 * _HID]                                         # (25, 30)
    bias = p_ref[0:1, _BIAS_COL:_BIAS_COL + 3 * _HID]                    # (1, 30)
    kqv = jnp.dot(x, w, preferred_element_type=jnp.float32) + bias       # (B, 30)

    k = kqv[:, 0:_HID]
    q = kqv[:, _HID:2 * _HID]
    v = kqv[:, 2 * _HID:3 * _HID]

    # scores = k @ q^T, contracting the feature axis directly (no transpose)
    scores = lax.dot_general(k, q, (((1,), (1,)), ((), ())),
                             preferred_element_type=jnp.float32)         # (B, B)

    # numerically-stable softmax (exact normalization)
    scores = scores - jnp.max(scores, axis=-1, keepdims=True)
    e = jnp.exp(scores)
    probs = e / jnp.sum(e, axis=-1, keepdims=True)

    # single store of the exact-size result
    o_ref[...] = jnp.dot(probs, v, preferred_element_type=jnp.float32)   # (B, 10)


def pack_params(w, b, wk, bk, wq, bq, wv, bv):
    """Pre-compose both affine layers and pack into one (32,128) f32 slab.

    w/wk/wq/wv are (in,out) (transposed vs torch); biases are (1,out).
    Exact algebraic fold (up to f32 rounding):
        kqv = ((x1+x2) @ w + 2*b) @ Wkqv + bkqv
            = (x1+x2) @ (w @ Wkqv) + ((2*b) @ Wkqv + bkqv)
    """
    wkqv = jnp.concatenate([wk, wq, wv], axis=1)            # (10, 30)
    bkqv = jnp.concatenate([bk, bq, bv], axis=1)            # (1, 30)
    w_comb = w @ wkqv                                       # (25, 30)
    b_comb = (2.0 * b) @ wkqv + bkqv                        # (1, 30)
    slab = jnp.zeros(_SLAB_SHAPE, jnp.float32)
    slab = slab.at[0:_IN, 0:3 * _HID].set(w_comb)
    slab = slab.at[0, _BIAS_COL:_BIAS_COL + 3 * _HID].set(b_comb[0])
    return slab


def _model_forward(x1, x2, param_slab):
    B = x1.shape[0]
    vmem = pl.BlockSpec(memory_space=pltpu.MemorySpace.VMEM)
    flops = 2 * B * _IN * 3 * _HID + 2 * B * B * _HID + 2 * B * B * _HID
    bytes_accessed = 4 * (param_slab.size + x1.size + x2.size + B * _HID)
    return pl.pallas_call(
        _attn_kernel,
        out_shape=jax.ShapeDtypeStruct((B, _HID), jnp.float32),
        in_specs=[vmem, vmem, vmem],
        out_specs=vmem,
        cost_estimate=pl.CostEstimate(flops=flops,
                                      transcendentals=B * B,
                                      bytes_accessed=bytes_accessed),
    )(x1, x2, param_slab)


model_forward = jax.jit(_model_forward)


def _init_linear(key, fan_in, fan_out):
    """torch.nn.Linear-style init: uniform +/- 1/sqrt(fan_in).
    Returns W of shape (in,out) and b of shape (1,out)."""
    kw, kb = jax.random.split(key)
    bound = 1.0 / jnp.sqrt(jnp.float32(fan_in))
    w = jax.random.uniform(kw, (fan_in, fan_out), jnp.float32, -bound, bound)
    b = jax.random.uniform(kb, (1, fan_out), jnp.float32, -bound, bound)
    return w, b


def _reference(x1, x2, params):
    w, b, wk, bk, wq, bq, wv, bv = params
    v1 = x1 @ w + b
    v2 = x2 @ w + b
    v3 = v1 + v2
    v4 = v3 @ wk + bk
    v5 = v3 @ wq + bq
    v6 = v3 @ wv + bv
    v7 = v4 @ v5.T
    v8 = jax.nn.softmax(v7, axis=-1)
    return v8 @ v6


if __name__ == "__main__":
    root = jax.random.PRNGKey(0)
    k_x1, k_x2, k_lin, k_key, k_qry, k_val, k_b1, k_b2 = jax.random.split(root, 8)

    w, b = _init_linear(k_lin, _IN, _HID)
    wk, bk = _init_linear(k_key, _HID, _HID)
    wq, bq = _init_linear(k_qry, _HID, _HID)
    wv, bv = _init_linear(k_val, _HID, _HID)
    params = (w, b, wk, bk, wq, bq, wv, bv)
    slab = pack_params(*params)

    # Module-spec shapes: (1, 25)
    x1 = jax.random.normal(k_x1, (1, _IN), jnp.float32)
    x2 = jax.random.normal(k_x2, (1, _IN), jnp.float32)
    out = jax.block_until_ready(model_forward(x1, x2, slab))
    ref = _reference(x1, x2, params)
    assert out.shape == (1, _HID)
    # pre-composed weights change f32 rounding slightly vs. sequential ref
    assert jnp.allclose(out, ref, atol=1e-4, rtol=1e-4), float(jnp.max(jnp.abs(out - ref)))

    # B >= 8 case so the attention path (non-trivial softmax) is exercised.
    xb1 = jax.random.normal(k_b1, (8, _IN), jnp.float32)
    xb2 = jax.random.normal(k_b2, (8, _IN), jnp.float32)
    out8 = jax.block_until_ready(model_forward(xb1, xb2, slab))
    ref8 = _reference(xb1, xb2, params)
    assert out8.shape == (8, _HID)
    assert jnp.allclose(out8, ref8, atol=1e-4, rtol=1e-4), float(jnp.max(jnp.abs(out8 - ref8)))

    print("KERNEL_OK")
</pallas_src>

<mosaic_0001>
module attributes {stable_mosaic.version = 11 : i64} {
  func.func @_attn_kernel(%arg0: memref<1x25xf32, #tpu.memory_space<vmem>>, %arg1: memref<1x25xf32, #tpu.memory_space<vmem>>, %arg2: memref<32x128xf32, #tpu.memory_space<vmem>>, %arg3: memref<1x10xf32, #tpu.memory_space<vmem>>) attributes {dimension_semantics = [], scalar_prefetch = 0 : i64, scratch_operands = 0 : i64, tpu.core_type = #tpu.core_type<tc>} {
    %c0 = arith.constant 0 : index
    %c0_0 = arith.constant 0 : index
    %0 = vector.load %arg0[%c0, %c0_0] : memref<1x25xf32, #tpu.memory_space<vmem>>, vector<1x25xf32>
    %c0_1 = arith.constant 0 : index
    %c0_2 = arith.constant 0 : index
    %1 = vector.load %arg1[%c0_1, %c0_2] : memref<1x25xf32, #tpu.memory_space<vmem>>, vector<1x25xf32>
    %2 = arith.addf %0, %1 : vector<1x25xf32>
    %c0_3 = arith.constant 0 : index
    %c0_4 = arith.constant 0 : index
    %3 = vector.load %arg2[%c0_3, %c0_4] : memref<32x128xf32, #tpu.memory_space<vmem>>, vector<25x30xf32>
    %c0_5 = arith.constant 0 : index
    %c64 = arith.constant 64 : index
    %4 = vector.load %arg2[%c0_5, %c64] : memref<32x128xf32, #tpu.memory_space<vmem>>, vector<1x30xf32>
    %cst = arith.constant dense<0.000000e+00> : vector<1x30xf32>
    %5 = tpu.matmul %2, %3, %cst {dimension_numbers = #tpu.dot_dimension_numbers<[1], [0], [0], [1], [0, 0, 1, 1], [], []>} : vector<1x25xf32>, vector<25x30xf32>, vector<1x30xf32> -> vector<1x30xf32>
    %6 = arith.addf %5, %4 : vector<1x30xf32>
    %7 = vector.extract_strided_slice %6 {offsets = [0, 0], sizes = [1, 10], strides = [1, 1]} : vector<1x30xf32> to vector<1x10xf32>
    %8 = vector.extract_strided_slice %6 {offsets = [0, 10], sizes = [1, 10], strides = [1, 1]} : vector<1x30xf32> to vector<1x10xf32>
    %9 = vector.extract_strided_slice %6 {offsets = [0, 20], sizes = [1, 10], strides = [1, 1]} : vector<1x30xf32> to vector<1x10xf32>
    %cst_6 = arith.constant dense<0.000000e+00> : vector<1x1xf32>
    %10 = tpu.matmul %7, %8, %cst_6 {dimension_numbers = #tpu.dot_dimension_numbers<[1], [1], [0], [0], [0, 0, 1, 0], [], []>} : vector<1x10xf32>, vector<1x10xf32>, vector<1x1xf32> -> vector<1x1xf32>
    %cst_7 = arith.constant dense<0xFF800000> : vector<1xf32>
    %11 = vector.multi_reduction <maximumf>, %10, %cst_7 [1] : vector<1x1xf32> to vector<1xf32>
    %12 = vector.shape_cast %11 : vector<1xf32> to vector<1x1xf32>
    %13 = arith.subf %10, %12 : vector<1x1xf32>
    %14 = math.exp %13 : vector<1x1xf32>
    %cst_8 = arith.constant dense<0.000000e+00> : vector<1xf32>
    %15 = vector.multi_reduction <add>, %14, %cst_8 [1] : vector<1x1xf32> to vector<1xf32>
    %16 = vector.shape_cast %15 : vector<1xf32> to vector<1x1xf32>
    %17 = arith.divf %14, %16 : vector<1x1xf32>
    %cst_9 = arith.constant dense<0.000000e+00> : vector<1x10xf32>
    %18 = tpu.matmul %17, %9, %cst_9 {dimension_numbers = #tpu.dot_dimension_numbers<[1], [0], [0], [1], [0, 0, 1, 1], [], []>} : vector<1x1xf32>, vector<1x10xf32>, vector<1x10xf32> -> vector<1x10xf32>
    %c0_10 = arith.constant 0 : index
    %c0_11 = arith.constant 0 : index
    %19 = vector.load %arg3[%c0_10, %c0_11] : memref<1x10xf32, #tpu.memory_space<vmem>>, vector<1x10xf32>
    tpu.vector_store %arg3[%c0_10, %c0_11], %18 {strides = array<i32>} : memref<1x10xf32, #tpu.memory_space<vmem>>, vector<1x10xf32>,
    return
  }
}

</mosaic_0001>

<bundles_post_ra>
// kernel: _model_forward.1
= control target key start
LH: loop header
LB: loop body
LE: loop exit
PB: predicated region body
PF: predicated region fallthrough
CT: control target
= control target key end

     0   :  { %8 = vsyncpa [#allocation3], 0  ;;  %s394_s0 = inlined_call_operand.hbm [shape: f32[1,25], index: 0, kind: input, shape index: {}]   ;;  %s395_s1 = inlined_call_operand.vmem [shape: f32[1,25], index: 1, kind: input, shape index: {}]   ;;  %s396_s2 = inlined_call_operand.hbm [shape: f32[32,128], index: 2, kind: input, shape index: {}]   ;;  %s397_s3 = inlined_call_operand.hbm [shape: f32[1,10], index: 3, kind: output, shape index: {}]  }
   0x1   :  { %9 = vsyncpa [#allocation6], 0 }
   0x2   :  { %10 = vsyncpa [#allocation4], 0  ;;  %s348_s12 = smov [#allocation2]   ;;  %s349_s14 = smov [#allocation5]  }
   0x3   :  { %s17_s13 = sshll.u32 %s348_s12, 4  ;;  %s28_s15 = sshll.u32 %s349_s14, 4  ;;  %s18_s13 = int_to_ptr.vmem [resolvable:$true] %s17_s13  ;;  %s29_s15 = int_to_ptr.vmem [resolvable:$true] %s28_s15 }
   0x4   :  { %s290_s16 = scalar_lea.vmem %s18_s13, 16  ;;  %s294_s17 = scalar_lea.vmem %s18_s13, 32 }
   0x5   :  { %p291_p0 = scmp.ne.s32.totalorder %s18_s13, %s290_s16  ;;  %p295_p1 = scmp.lt.s32.totalorder %s18_s13, %s18_s13 }
   0x6   :  { %p296_p2 = scmp.lt.s32.totalorder %s294_s17, %s290_s16 }
   0x8   :  { %p297_p3 = por %p296_p2, %p295_p1 }
   0xa   :  { %p298_p4 = pnand %p297_p3, %p291_p0 }
   0xc   :  { %301 = shalt.err (!%p298_p4)
}
   0xd   :  { %20 = dma.hbm_to_vmem [thread:$0]  %s394_s0, 16, %s18_s13, [#allocation3]  }
   0xe   :  { %s310_s20 = scalar_lea.vmem %s29_s15, 512  ;;  %p315_p6 = scmp.lt.s32.totalorder %s29_s15, %s29_s15 }
   0xf   :  { %p311_p5 = scmp.ne.s32.totalorder %s29_s15, %s310_s20  ;;  %p316_p7 = scmp.lt.s32.totalorder %s310_s20, %s310_s20 }
  0x11   :  { %p317_p8 = por %p316_p7, %p315_p6 }
  0x13   :  { %p318_p9 = pnand %p317_p8, %p311_p5 }
  0x15   :  { %321 = shalt.err (!%p318_p9)
}
  0x16   :  { %s350_s21 = smov 128   ;;  %s351_s22 = smov 8  }
  0x17   :  { %34 = dma.hbm_to_vmem [thread:$0]  %s396_s2, 512, %s29_s15, [#allocation6], %s350_s21, %s350_s21, %s351_s22  }
  0x18   :  { %342 = dma.done.wait [#allocation3], 16  }
  0x19   :  { %343 = vsyncadd [#allocation3], 4294967280 }
  0x1a   :  { %344 = dma.done.wait [#allocation6], 512  }
  0x1b   :  { %345 = vsyncadd [#allocation6], 4294966784  ;;  %v352_v0 = vmov 0.0   ;;  %vm353_vm0 = vmmov 0   ;;  %vm57_vm1 = vcmask 1040384   ;;  %v46_v2 = vld [vmem:[#allocation5 + $0x10] sm:$0xff] }
  0x1c   :  { %252 = vmatprep.subr.mxu0 %v352_v0  ;;  %260 = vmatprep.mubr.msk.f32.mxu0 %vm353_vm0, %v352_v0  ;;  %v47_v1 = vld [vmem:[#allocation5 + $0x18] sm:$0x1]  ;;  %v41_v3 = vld [vmem:[#allocation2] sm:$0x1]  ;;  %v45_v5 = vld [vmem:[#allocation5 + $0x8] sm:$0xff]  ;;  %s354_s2 = smov 64  }
  0x1d   :  { %263 = vmatprep.subr.mxu1 %v352_v0  ;;  %265 = vmatprep.mubr.msk.f32.mxu1 %vm353_vm0, %v352_v0  ;;  %v42_v4 = vld [vmem:[%s395_s1] sm:$0x1]  ;;  %v48_v6 = vld [vmem:[#allocation5] sm:$0x1]  ;;  %vm53_vm2 = vcmask 203776   ;;  %s355_s26 = smov 118  }
  0x1e   :  { %253 = vmatpush3.msk.msra.mxu0 %vm57_vm1, %v47_v1  ;;  %50 = vrot.lane.b32.xlu0 %v48_v6, %s354_s2  ;;  %v44_v7 = vld [vmem:[#allocation5] sm:$0xff]  ;;  %v43_v8 = vadd.f32 %v42_v4, %v41_v3  ;;  %vm136_vm3 = vcmask 73728   ;;  %s356_s1 = smov 108   ;;  %vm148_vm4 = vcmask 7168   ;;  %s357_s27 = smov [#allocation7]  }
  0x1f   :  { %254 = vmatprep.subr.mxu0 %v352_v0  ;;  %s231_s28 = sshll.u32 %s357_s27, 4  ;;  %s232_s28 = int_to_ptr.vmem [resolvable:$true] %s231_s28 }
  0x20   :  { %255 = vmatpush3.msra.mxu0 %v46_v2  ;;  %s322_s29 = scalar_lea.vmem %s232_s28, 16  ;;  %s326_s30 = scalar_lea.vmem %s232_s28, 32 }
  0x21   :  { %256 = vmatprep.subr.mxu0 %v352_v0  ;;  %p323_p10 = scmp.ne.s32.totalorder %s232_s28, %s322_s29  ;;  %p327_p11 = scmp.lt.s32.totalorder %s232_s28, %s232_s28 }
  0x22   :  { %257 = vmatpush3.msra.mxu0 %v45_v5  ;;  %p328_p12 = scmp.lt.s32.totalorder %s326_s30, %s322_s29 }
  0x23   :  { %258 = vmatprep.subr.mxu0 %v352_v0 }
  0x24   :  { %259 = vmatpush3.msra.mxu0 %v44_v7  ;;  %p329_p13 = por %p328_p12, %p327_p11 }
  0x25   :  { %261 = vmatmul.mubr.msk.f32.vlgmr.msra.gmra.mxu0 %vm53_vm2, %v43_v8 }
  0x26   :  { %p330_p0 = pnand %p329_p13, %p323_p10 }
  0x90   :  { %v51_v9 = vpop.permute.xlu0 %50 }
  0xe5   :  { %v127_v10 = vpop.f32.mrf.mxu0 }
  0xe6   :  { %v128_v11 = vadd.f32 %v127_v10, %v51_v9 }
  0xe7   :  { %v262_v12 = vpop.f32.mrf.mxu0 }
  0xe8   :  { %132 = vrot.lane.b32.xlu0 %v128_v11, %s355_s26 }
 0x15a   :  { %v133_v13 = vpop.permute.xlu0 %132 }
 0x15b   :  { %v135_v14 = vmul.f32 %v133_v13, %v128_v11 }
 0x15d   :  { %v137_v15 = vsel %vm136_vm3, %v135_v14, 0.0 }
 0x15e   :  { %138 = vadd.xlane.f32.xlu1 %v137_v15 }
 0x16f   :  { %146 = vrot.lane.b32.xlu1 %v128_v11, %s356_s1 }
 0x1e7   :  { %v139_v16 = vpop.xlane.xlu1 %138 }
 0x1e8   :  { %v140_v17 = vsub.f32 %v139_v16, %v139_v16 }
 0x1ea   :  { %v141_v18 = vmul.f32 1.442695, %v140_v17 }
 0x1eb   :  { %v147_v19 = vpop.permute.xlu1 %146 }
 0x1ec   :  { %278 = vpow2.f32 %v141_v18  ;;  %264 = vmatpush3.msk.msra.mxu1 %vm57_vm1, %v147_v19 }
 0x1f9   :  { %v279_v20 = vpop.eup %278 }
 0x1fa   :  { %280 = vrcp.f32 %v279_v20 }
 0x207   :  { %v281_v21 = vpop.eup %280 }
 0x208   :  { %v145_v22 = vmul.f32 %v281_v21, %v279_v20 }
 0x20a   :  { %266 = vmatmul.mubr.msk.f32.vlgmr.msra.gmra.mxu1 %vm148_vm4, %v145_v22 }
 0x2ca   :  { %v220_v23 = vpop.f32.mrf.mxu1 }
 0x2cb   :  { %224 = vst.msk [vmem:[#allocation7] sm:$0x1] %vm136_vm3, %v220_v23 }
 0x2cc   :  { %v267_v24 = vpop.f32.mrf.mxu1 }
 0x2cd   :  { %333 = shalt.err (!%p330_p0)
}
 0x2ce   :  { %234 = dma.vmem_to_hbm [thread:$0]  %s232_s28, 16, %s397_s3, [#allocation4]  }
 0x2cf   :  { %346 = dma.done.wait [#allocation4], 16  }
 0x2d0   :  { %347 = vsyncadd [#allocation4], 4294967280 }
 0x2d1   :  { %238 = vsyncpa [#allocation3], 1 }
 0x2d2   :  { %239 = vsyncpa [#allocation6], 1 }
 0x2d3   :  { %240 = vsyncpa [#allocation4], 1 }

</bundles_post_ra>
